<compile_context>
chip_gen: v7x
topology: tpu7x:2x2x1
jax: 0.10.0
libtpu: 0.0.40
codegen_flags: <defaults>
</compile_context>

<pallas_src>
import math

import jax
import jax.numpy as jnp
from jax.experimental import pallas as pl
from jax.experimental.pallas import tpu as pltpu


# ------------------------------ tiling helpers ------------------------------

_VMEM_LIMIT_BYTES = 48 * 1024 * 1024   # above every scoped default, < v7x physical
_FULL_K_MAX = 2048                     # single-shot (no reduction grid axis) below this

_MM2D_PARAMS = pltpu.CompilerParams(
    dimension_semantics=("parallel", "parallel"),
    vmem_limit_bytes=_VMEM_LIMIT_BYTES)
_MM3D_PARAMS = pltpu.CompilerParams(
    dimension_semantics=("parallel", "parallel", "arbitrary"),
    vmem_limit_bytes=_VMEM_LIMIT_BYTES)
_ATTN_PARAMS = pltpu.CompilerParams(
    dimension_semantics=("parallel", "parallel", "parallel", "arbitrary"),
    vmem_limit_bytes=_VMEM_LIMIT_BYTES)


def _round_up(x, m):
    return ((x + m - 1) // m) * m


def _pick_tile(dim, candidates):
    """Largest candidate evenly dividing `dim`, else the full dim (full-dim
    blocks are always legal; callers pad large axes to a 128 multiple first)."""
    for c in candidates:
        if dim % c == 0:
            return c
    return dim


def _maybe_pad_rows(x, align=128):
    """Pad axis 0 of a 2-D array up to a multiple of `align` when it is both
    larger than `align` and misaligned (keeps 128/256/512 tiles + pipelining
    instead of one giant full-dim block)."""
    m = x.shape[0]
    if m > align and m % align != 0:
        mp = _round_up(m, align)
        x = jnp.pad(x, ((0, mp - m), (0, 0)))
    return x, m


def _heads_per_block(num_heads, dim_head):
    """Divisor hb of H so that hb*dim_head hits 256 (preferred) or 128 lanes;
    falls back to any multiple-of-128 width, else all heads (tiny models)."""
    for target in (256, 128):
        for hb in range(1, num_heads + 1):
            if num_heads % hb == 0 and hb * dim_head == target:
                return hb
    for hb in range(1, num_heads + 1):
        if num_heads % hb == 0 and (hb * dim_head) % 128 == 0:
            return hb
    return num_heads


# ------------------------------- Pallas kernels ------------------------------

# --- full-K projections (2-D grid, no accumulator) ---

def _proj_fullk_kernel(x_ref, w_ref, o_ref):
    o_ref[...] = jnp.dot(x_ref[...], w_ref[...],
                         preferred_element_type=jnp.float32).astype(o_ref.dtype)


def _proj_bias_fullk_kernel(x_ref, w_ref, b_ref, o_ref):
    acc = jnp.dot(x_ref[...], w_ref[...], preferred_element_type=jnp.float32)
    o_ref[...] = (acc + b_ref[...].astype(jnp.float32)).astype(o_ref.dtype)


def _kv_proj_fullk_kernel(k_ref, v_ref, wk_ref, wv_ref, ko_ref, vo_ref):
    ko_ref[...] = jnp.dot(k_ref[...], wk_ref[...],
                          preferred_element_type=jnp.float32).astype(ko_ref.dtype)
    vo_ref[...] = jnp.dot(v_ref[...], wv_ref[...],
                          preferred_element_type=jnp.float32).astype(vo_ref.dtype)


# --- tiled-K projections (3-D grid, f32 VMEM accumulator) for very large K ---

def _proj_kernel(x_ref, w_ref, o_ref, acc_ref):
    @pl.when(pl.program_id(2) == 0)
    def _():
        acc_ref[...] = jnp.zeros(acc_ref.shape, acc_ref.dtype)

    acc_ref[...] += jnp.dot(x_ref[...], w_ref[...],
                            preferred_element_type=jnp.float32)

    @pl.when(pl.program_id(2) == pl.num_programs(2) - 1)
    def _():
        o_ref[...] = acc_ref[...].astype(o_ref.dtype)


def _proj_bias_kernel(x_ref, w_ref, b_ref, o_ref, acc_ref):
    @pl.when(pl.program_id(2) == 0)
    def _():
        acc_ref[...] = jnp.zeros(acc_ref.shape, acc_ref.dtype)

    acc_ref[...] += jnp.dot(x_ref[...], w_ref[...],
                            preferred_element_type=jnp.float32)

    @pl.when(pl.program_id(2) == pl.num_programs(2) - 1)
    def _():
        o_ref[...] = (acc_ref[...] + b_ref[...].astype(jnp.float32)
                      ).astype(o_ref.dtype)


def _kv_proj_kernel(k_ref, v_ref, wk_ref, wv_ref, ko_ref, vo_ref,
                    kacc_ref, vacc_ref):
    @pl.when(pl.program_id(2) == 0)
    def _():
        kacc_ref[...] = jnp.zeros(kacc_ref.shape, kacc_ref.dtype)
        vacc_ref[...] = jnp.zeros(vacc_ref.shape, vacc_ref.dtype)

    kacc_ref[...] += jnp.dot(k_ref[...], wk_ref[...],
                             preferred_element_type=jnp.float32)
    vacc_ref[...] += jnp.dot(v_ref[...], wv_ref[...],
                             preferred_element_type=jnp.float32)

    @pl.when(pl.program_id(2) == pl.num_programs(2) - 1)
    def _():
        ko_ref[...] = kacc_ref[...].astype(ko_ref.dtype)
        vo_ref[...] = vacc_ref[...].astype(vo_ref.dtype)


# --- flash-style attention (softmax scale pre-folded into w_q) ---

def _attn_kernel(q_ref, k_ref, v_ref, o_ref, m_sc, l_sc, acc_sc):
    """Refs (batch / head-block dims squeezed by the BlockSpecs):
      q_ref: (hb, tq, d)   k_ref/v_ref: (hb, ts, d)   o_ref: (tq, hb*d)
    Scratch: m/l (hb, tq, 1) f32, acc (hb, tq, d) f32."""
    kv_step = pl.program_id(3)

    @pl.when(kv_step == 0)
    def _():
        m_sc[...] = jnp.full(m_sc.shape, -jnp.inf, dtype=m_sc.dtype)
        l_sc[...] = jnp.zeros(l_sc.shape, l_sc.dtype)
        acc_sc[...] = jnp.zeros(acc_sc.shape, acc_sc.dtype)

    # Operands stay in their native (bf16) dtype; f32 accumulation on the MXU.
    s = jnp.einsum("hqd,hkd->hqk", q_ref[...], k_ref[...],
                   preferred_element_type=jnp.float32)          # (hb, tq, ts)

    m_prev = m_sc[...]
    m_new = jnp.maximum(m_prev, s.max(axis=-1, keepdims=True))
    alpha = jnp.exp(m_prev - m_new)
    p = jnp.exp(s - m_new)
    l_sc[...] = alpha * l_sc[...] + p.sum(axis=-1, keepdims=True)
    acc_sc[...] = alpha * acc_sc[...] + jnp.einsum(
        "hqk,hkd->hqd", p.astype(v_ref.dtype), v_ref[...],
        preferred_element_type=jnp.float32)
    m_sc[...] = m_new

    @pl.when(kv_step == pl.num_programs(3) - 1)
    def _():
        hb = acc_sc.shape[0]
        inv = pl.reciprocal(l_sc[...], approx=True)              # (hb, tq, 1)
        out = acc_sc[...] * inv                                  # (hb, tq, d) f32
        # 'h q d -> q (h d)' as a single lane-dense store (one unmasked
        # full-width store per q block instead of hb masked d-lane stores).
        out2d = jnp.concatenate([out[j] for j in range(hb)], axis=-1)
        o_ref[...] = out2d.astype(o_ref.dtype)


# ------------------------------- JAX wrappers --------------------------------

def _pallas_matmul(x, w, bias=None, out_dtype=None):
    """y = x @ w (+ bias). x: (M, K), w: (K, N)."""
    if out_dtype is None:
        out_dtype = x.dtype
    x, m_orig = _maybe_pad_rows(x)
    M, K = x.shape
    Kw, N = w.shape
    assert K == Kw
    tm = _pick_tile(M, (512, 256, 128))
    tn = _pick_tile(N, (512, 256, 128))

    if bias is not None:
        bias2 = bias.reshape(1, N)

    if K <= _FULL_K_MAX:
        in_specs = [pl.BlockSpec((tm, K), lambda i, j: (i, 0)),
                    pl.BlockSpec((K, tn), lambda i, j: (0, j))]
        if bias is None:
            kernel, args = _proj_fullk_kernel, (x, w)
        else:
            kernel, args = _proj_bias_fullk_kernel, (x, w, bias2)
            in_specs.append(pl.BlockSpec((1, tn), lambda i, j: (0, j)))
        out = pl.pallas_call(
            kernel,
            out_shape=jax.ShapeDtypeStruct((M, N), out_dtype),
            grid=(M // tm, N // tn),
            in_specs=in_specs,
            out_specs=pl.BlockSpec((tm, tn), lambda i, j: (i, j)),
            compiler_params=_MM2D_PARAMS,
        )(*args)
    else:
        tk = _pick_tile(K, (512, 256, 128))
        in_specs = [pl.BlockSpec((tm, tk), lambda i, j, k: (i, k)),
                    pl.BlockSpec((tk, tn), lambda i, j, k: (k, j))]
        if bias is None:
            kernel, args = _proj_kernel, (x, w)
        else:
            kernel, args = _proj_bias_kernel, (x, w, bias2)
            in_specs.append(pl.BlockSpec((1, tn), lambda i, j, k: (0, j)))
        out = pl.pallas_call(
            kernel,
            out_shape=jax.ShapeDtypeStruct((M, N), out_dtype),
            grid=(M // tm, N // tn, K // tk),
            in_specs=in_specs,
            out_specs=pl.BlockSpec((tm, tn), lambda i, j, k: (i, j)),
            scratch_shapes=[pltpu.VMEM((tm, tn), jnp.float32)],
            compiler_params=_MM3D_PARAMS,
        )(*args)
    return out[:m_orig]


def _pallas_kv_matmul(keys2d, values2d, w_k, w_v, out_dtype):
    """Fused K and V projections: one launch, shared pipeline."""
    m_orig = keys2d.shape[0]
    keys2d, _ = _maybe_pad_rows(keys2d)
    values2d, _ = _maybe_pad_rows(values2d)
    M, K = keys2d.shape
    _, N = w_k.shape
    tm = _pick_tile(M, (512, 256, 128))
    tn = _pick_tile(N, (512, 256, 128))

    if K <= _FULL_K_MAX:
        ko, vo = pl.pallas_call(
            _kv_proj_fullk_kernel,
            out_shape=(jax.ShapeDtypeStruct((M, N), out_dtype),
                       jax.ShapeDtypeStruct((M, N), out_dtype)),
            grid=(M // tm, N // tn),
            in_specs=[pl.BlockSpec((tm, K), lambda i, j: (i, 0)),
                      pl.BlockSpec((tm, K), lambda i, j: (i, 0)),
                      pl.BlockSpec((K, tn), lambda i, j: (0, j)),
                      pl.BlockSpec((K, tn), lambda i, j: (0, j))],
            out_specs=(pl.BlockSpec((tm, tn), lambda i, j: (i, j)),
                       pl.BlockSpec((tm, tn), lambda i, j: (i, j))),
            compiler_params=_MM2D_PARAMS,
        )(keys2d, values2d, w_k, w_v)
    else:
        tk = _pick_tile(K, (512, 256, 128))
        ko, vo = pl.pallas_call(
            _kv_proj_kernel,
            out_shape=(jax.ShapeDtypeStruct((M, N), out_dtype),
                       jax.ShapeDtypeStruct((M, N), out_dtype)),
            grid=(M // tm, N // tn, K // tk),
            in_specs=[pl.BlockSpec((tm, tk), lambda i, j, k: (i, k)),
                      pl.BlockSpec((tm, tk), lambda i, j, k: (i, k)),
                      pl.BlockSpec((tk, tn), lambda i, j, k: (k, j)),
                      pl.BlockSpec((tk, tn), lambda i, j, k: (k, j))],
            out_specs=(pl.BlockSpec((tm, tn), lambda i, j, k: (i, j)),
                       pl.BlockSpec((tm, tn), lambda i, j, k: (i, j))),
            scratch_shapes=[pltpu.VMEM((tm, tn), jnp.float32),
                            pltpu.VMEM((tm, tn), jnp.float32)],
            compiler_params=_MM3D_PARAMS,
        )(keys2d, values2d, w_k, w_v)
    return ko[:m_orig], vo[:m_orig]


def _pallas_attention(q, k, v):
    """q: (B, H, N, D), k/v: (B, H, S, D) -> (B, N, H*D).
    Softmax scale is already folded into q (via w_q); the
    'b h n d -> b n (h d)' rearrange is folded into the out_spec."""
    B, H, N, D = q.shape
    S = k.shape[2]
    n_orig = N
    if N > 128 and N % 128 != 0:
        Np = _round_up(N, 128)
        q = jnp.pad(q, ((0, 0), (0, 0), (0, Np - N), (0, 0)))
        N = Np

    hb = _heads_per_block(H, D)
    tq = _pick_tile(N, (256, 128))
    ts = _pick_tile(S, (512, 256, 128))
    # TODO(synk): pad + mask the key axis when S is a large non-128 multiple;
    # currently falls back to a single full-S KV block (correct, not tiled).
    n_kv = S // ts

    kv_kwargs = {}
    if n_kv >= 2:
        kv_kwargs = dict(pipeline_mode=pl.Buffered(3))  # deeper K/V prefetch

    out = pl.pallas_call(
        _attn_kernel,
        out_shape=jax.ShapeDtypeStruct((B, N, H * D), q.dtype),
        grid=(B, H // hb, N // tq, n_kv),
        in_specs=[
            pl.BlockSpec((None, hb, tq, D), lambda b, h, qi, ki: (b, h, qi, 0)),
            pl.BlockSpec((None, hb, ts, D), lambda b, h, qi, ki: (b, h, ki, 0),
                         **kv_kwargs),
            pl.BlockSpec((None, hb, ts, D), lambda b, h, qi, ki: (b, h, ki, 0),
                         **kv_kwargs),
        ],
        out_specs=pl.BlockSpec((None, tq, hb * D),
                               lambda b, h, qi, ki: (b, qi, h)),
        scratch_shapes=[
            pltpu.VMEM((hb, tq, 1), jnp.float32),   # running max m
            pltpu.VMEM((hb, tq, 1), jnp.float32),   # running sum l
            pltpu.VMEM((hb, tq, D), jnp.float32),   # accumulator
        ],
        compiler_params=_ATTN_PARAMS,
    )(q, k, v)
    return out[:, :n_orig]


class CrossAttentionPallas:
    """JAX/Pallas port of the PyTorch CrossAttention module."""

    def __init__(self, dim, heads=8, dim_head=64, dropout=0.0,
                 output_attention=False, key=None,
                 param_dtype=jnp.bfloat16):
        inner_dim = dim_head * heads
        self.dim = dim
        self.heads = heads
        self.dim_head = dim_head
        self.inner_dim = inner_dim
        self.scale = dim_head ** (-0.5)
        self.output_attention = output_attention
        self.project_out = not (heads == 1 and dim_head == dim)
        self.compute_dtype = param_dtype
        # dropout p=0.0 -> identity at inference/eval; nothing to do.

        if key is None:
            key = jax.random.PRNGKey(0)
        kq, kk, kv, kow, kob = jax.random.split(key, 5)

        # nn.Linear default init: U(-1/sqrt(fan_in), 1/sqrt(fan_in)).
        # Weights stored transposed for y = x @ W (shape (in, out)), in bf16
        # (half DMA, native MXU dtype); softmax scale folded into w_q.
        def lin_w(k, fan_in, fan_out):
            bound = 1.0 / math.sqrt(fan_in)
            return jax.random.uniform(k, (fan_in, fan_out), jnp.float32,
                                      minval=-bound, maxval=bound)

        self.w_q = (lin_w(kq, dim, inner_dim) * self.scale).astype(param_dtype)
        self.w_k = lin_w(kk, dim, inner_dim).astype(param_dtype)
        self.w_v = lin_w(kv, dim, inner_dim).astype(param_dtype)
        if self.project_out:
            self.w_o = lin_w(kow, inner_dim, dim).astype(param_dtype)
            bound = 1.0 / math.sqrt(inner_dim)
            self.b_o = jax.random.uniform(kob, (dim,), jnp.float32,
                                          minval=-bound, maxval=bound)
        else:
            self.w_o = None
            self.b_o = None

    def __call__(self, queries, keys, values):
        B, N, E = queries.shape
        _, S, _ = keys.shape
        H, D = self.heads, self.dim_head
        inner = self.inner_dim
        out_dtype = queries.dtype
        cd = self.compute_dtype

        qx = queries.reshape(B * N, E).astype(cd)
        kx = keys.reshape(B * S, E).astype(cd)
        vx = values.reshape(B * S, E).astype(cd)

        # --- projections (K and V fused into one launch) ---
        q = _pallas_matmul(qx, self.w_q)
        k, v = _pallas_kv_matmul(kx, vx, self.w_k, self.w_v, cd)

        # Exact PyTorch semantics: plain row-major reshape (B, N, H*D) ->
        # (B, H, N, D) (NOT a 'b n (h d) -> b h n d' rearrange).
        q = q.reshape(B, H, N, D)
        k = k.reshape(B, H, S, D)
        v = v.reshape(B, H, S, D)

        # --- flash-style attention; output already in (B, N, H*D) layout ---
        out = _pallas_attention(q, k, v)

        # --- output projection (bias) ---
        if self.project_out:
            out = _pallas_matmul(out.reshape(B * N, inner), self.w_o,
                                 bias=self.b_o, out_dtype=out_dtype)
            out = out.reshape(B, N, self.dim)
        else:
            out = out.astype(out_dtype)
        # TODO(synk): expose attention weights when output_attention=True.
        return out


# Pure-JAX reference (f32 math on the same bf16-rounded weights/inputs).
def _reference(mod, queries, keys, values):
    B, N, E = queries.shape
    _, S, _ = keys.shape
    H, D = mod.heads, mod.dim_head
    f32 = jnp.float32
    cd = mod.compute_dtype
    qx = queries.astype(cd).astype(f32)
    kx = keys.astype(cd).astype(f32)
    vx = values.astype(cd).astype(f32)
    q = (qx @ mod.w_q.astype(f32)).reshape(B, H, N, D)   # scale folded in w_q
    k = (kx @ mod.w_k.astype(f32)).reshape(B, H, S, D)
    v = (vx @ mod.w_v.astype(f32)).reshape(B, H, S, D)
    dots = jnp.einsum("bhnd,bhsd->bhns", q, k)
    att = jax.nn.softmax(dots, axis=-1)
    out = jnp.einsum("bhns,bhsd->bhnd", att, v)
    out = jnp.transpose(out, (0, 2, 1, 3)).reshape(B, N, H * D)
    if mod.project_out:
        out = out @ mod.w_o.astype(f32) + mod.b_o.astype(f32)
    return out.astype(queries.dtype)


if __name__ == "__main__":
    # Small shapes consistent with the module's forward.
    B, N, S = 2, 8, 8
    dim, heads, dim_head = 32, 4, 16

    key = jax.random.PRNGKey(0)
    kparam, kq, kk, kv = jax.random.split(key, 4)

    module = CrossAttentionPallas(dim, heads=heads, dim_head=dim_head,
                                  dropout=0.0, output_attention=False,
                                  key=kparam)

    queries = jax.random.normal(kq, (B, N, dim), jnp.float32)
    keys = jax.random.normal(kk, (B, S, dim), jnp.float32)
    values = jax.random.normal(kv, (B, S, dim), jnp.float32)

    out = jax.block_until_ready(module(queries, keys, values))
    assert out.shape == (B, N, dim), out.shape

    ref = _reference(module, queries, keys, values)
    # Tolerance accommodates bf16 intermediates and the EUP approximate
    # reciprocal used for the softmax normalization.
    err = float(jnp.max(jnp.abs(out - ref)))
    denom = max(1.0, float(jnp.max(jnp.abs(ref))))
    assert err <= 5e-2 * denom, f"mismatch vs reference: max abs err {err}"

    print("KERNEL_OK")
</pallas_src>

<mosaic_0001>
module attributes {stable_mosaic.version = 11 : i64} {
  func.func @_proj_fullk_kernel(%arg0: i32, %arg1: i32, %arg2: memref<16x32xbf16, #tpu.memory_space<vmem>>, %arg3: memref<32x64xbf16, #tpu.memory_space<vmem>>, %arg4: memref<16x64xbf16, #tpu.memory_space<vmem>>) attributes {dimension_semantics = [#tpu.dimension_semantics<parallel>, #tpu.dimension_semantics<parallel>], iteration_bounds = array<i64: 1, 1>, scalar_prefetch = 0 : i64, scratch_operands = 0 : i64, tpu.core_type = #tpu.core_type<tc>, window_params = [{transform_indices = @transform_0, window_bounds = array<i64: 16, 32>}, {transform_indices = @transform_1, window_bounds = array<i64: 32, 64>}, {transform_indices = @transform_2, window_bounds = array<i64: 16, 64>}]} {
    %c0 = arith.constant 0 : index
    %c0_0 = arith.constant 0 : index
    %0 = vector.load %arg2[%c0, %c0_0] : memref<16x32xbf16, #tpu.memory_space<vmem>>, vector<16x32xbf16>
    %c0_1 = arith.constant 0 : index
    %c0_2 = arith.constant 0 : index
    %1 = vector.load %arg3[%c0_1, %c0_2] : memref<32x64xbf16, #tpu.memory_space<vmem>>, vector<32x64xbf16>
    %cst = arith.constant dense<0.000000e+00> : vector<16x64xf32>
    %2 = tpu.matmul %0, %1, %cst {dimension_numbers = #tpu.dot_dimension_numbers<[1], [0], [0], [1], [0, 0, 1, 1], [], []>} : vector<16x32xbf16>, vector<32x64xbf16>, vector<16x64xf32> -> vector<16x64xf32>
    %3 = arith.truncf %2 : vector<16x64xf32> to vector<16x64xbf16>
    %c0_3 = arith.constant 0 : index
    %c0_4 = arith.constant 0 : index
    %4 = vector.load %arg4[%c0_3, %c0_4] : memref<16x64xbf16, #tpu.memory_space<vmem>>, vector<16x64xbf16>
    tpu.vector_store %arg4[%c0_3, %c0_4], %3 {strides = array<i32>} : memref<16x64xbf16, #tpu.memory_space<vmem>>, vector<16x64xbf16>,
    return
  }
  func.func @transform_0(%arg0: i32, %arg1: i32) -> (i32, i32) {
    %c0_i32 = arith.constant 0 : i32
    %c0_i32_0 = arith.constant 0 : i32
    return %arg0, %c0_i32 : i32, i32
  }
  func.func @transform_1(%arg0: i32, %arg1: i32) -> (i32, i32) {
    %c0_i32 = arith.constant 0 : i32
    %c0_i32_0 = arith.constant 0 : i32
    return %c0_i32, %arg1 : i32, i32
  }
  func.func @transform_2(%arg0: i32, %arg1: i32) -> (i32, i32) {
    %c0_i32 = arith.constant 0 : i32
    return %arg0, %arg1 : i32, i32
  }
}

</mosaic_0001>

<bundles_post_ra>
// kernel: tpu_custom_call.1
= control target key start
LH: loop header
LB: loop body
LE: loop exit
PB: predicated region body
PF: predicated region fallthrough
CT: control target
= control target key end

     0   :  { %7 = vsyncpa [#allocation3], 0  ;;  %s306_s0 = inlined_call_operand.hbm [shape: bf16[16,32], index: 0, kind: input, shape index: {}]   ;;  %s307_s1 = inlined_call_operand.hbm [shape: bf16[32,64], index: 1, kind: input, shape index: {}]   ;;  %s308_s2 = inlined_call_operand.hbm [shape: bf16[16,64], index: 2, kind: output, shape index: {}]  }
   0x1   :  { %8 = vsyncpa [#allocation6], 0 }
   0x2   :  { %9 = vsyncpa [#allocation4], 0  ;;  %s239_s9 = smov [#allocation2]   ;;  %s167_s13 = scalar_lea.hbm %s306_s0, 128 }
   0x3   :  { %s15_s10 = sshll.u32 %s239_s9, 4  ;;  %p168_p0 = scmp.ne.s32.totalorder %s306_s0, %s167_s13  ;;  %s16_s10 = int_to_ptr.vmem [resolvable:$true] %s15_s10 }
   0x4   :  { %p171_p1 = scmp.lt.u32.totalorder %s167_s13, %s306_s0 }
   0x6   :  { %p173_p2 = pnand %p171_p1, %p168_p0 }
   0x8   :  { %176 = shalt.err (!%p173_p2)
}
   0x9   :  { %s177_s18 = scalar_lea.vmem %s16_s10, 128  ;;  %p182_p4 = scmp.lt.s32.totalorder %s16_s10, %s16_s10 }
   0xa   :  { %p178_p3 = scmp.ne.s32.totalorder %s16_s10, %s177_s18  ;;  %p183_p5 = scmp.lt.s32.totalorder %s177_s18, %s177_s18 }
   0xc   :  { %p184_p6 = por %p183_p5, %p182_p4 }
   0xe   :  { %p185_p7 = pnand %p184_p6, %p178_p3 }
  0x10   :  { %188 = shalt.err (!%p185_p7)
}
  0x11   :  { %s240_s19 = smov 64   ;;  %s241_s20 = smov 4  }
  0x12   :  { %21 = dma.hbm_to_vmem [thread:$0]  %s306_s0, 128, %s16_s10, [#allocation3], %s240_s19, %s240_s19, %s241_s20  }
  0x13   :  { %s242_s23 = smov [#allocation5]   ;;  %s189_s27 = scalar_lea.hbm %s307_s1, 256 }
  0x14   :  { %s27_s24 = sshll.u32 %s242_s23, 4  ;;  %p190_p8 = scmp.ne.s32.totalorder %s307_s1, %s189_s27  ;;  %s28_s24 = int_to_ptr.vmem [resolvable:$true] %s27_s24 }
  0x15   :  { %p193_p9 = scmp.lt.u32.totalorder %s189_s27, %s307_s1 }
  0x17   :  { %p195_p10 = pnand %p193_p9, %p190_p8 }
  0x19   :  { %198 = shalt.err (!%p195_p10)
}
  0x1a   :  { %s199_s4 = scalar_lea.vmem %s28_s24, 256  ;;  %p204_p12 = scmp.lt.s32.totalorder %s28_s24, %s28_s24 }
  0x1b   :  { %p200_p11 = scmp.ne.s32.totalorder %s28_s24, %s199_s4  ;;  %p205_p13 = scmp.lt.s32.totalorder %s199_s4, %s199_s4 }
  0x1d   :  { %p206_p0 = por %p205_p13, %p204_p12 }
  0x1f   :  { %p207_p1 = pnand %p206_p0, %p200_p11 }
  0x21   :  { %210 = shalt.err (!%p207_p1)
}
  0x22   :  { %33 = dma.hbm_to_vmem [thread:$0]  %s307_s1, 256, %s28_s24, [#allocation6], %s240_s19, %s240_s19, %s241_s20  }
  0x23   :  { %233 = dma.done.wait [#allocation3], 128  }
  0x24   :  { %234 = vsyncadd [#allocation3], 4294967168 }
  0x25   :  { %235 = dma.done.wait [#allocation6], 256  }
  0x26   :  { %236 = vsyncadd [#allocation6], 4294967040  ;;  %v243_v0 = vmov 0.0   ;;  %vm244_vm0 = vmmov 0   ;;  %v164_v1 = vld [vmem:[#allocation5] sm:$0xff]   ;;  %v165_v2 = vld [vmem:[#allocation5 + $0x8] sm:$0xff]  }
  0x27   :  { %149 = vmatprep.subr.bf16.mxu0 %v243_v0  ;;  %153 = vmatprep.mubr.msk.bf16.mxu0 %vm244_vm0, %v243_v0  ;;  %v166_v3 = vld [vmem:[#allocation2] sm:$0xff]   ;;  %vm64_vm1 = vcmask 261120   ;;  %vm117_vm2 = vcmask 519168   ;;  %s245_s6 = smov [#allocation7]  }
  0x28   :  { %150 = vmatpush3.bf16.msra.mxu0 %v164_v1  ;;  %s125_s1 = sshll.u32 %s245_s6, 4  ;;  %s126_s1 = int_to_ptr.vmem [resolvable:$true] %s125_s1 }
  0x29   :  { %151 = vmatprep.subr.bf16.mxu0 %v243_v0  ;;  %s211_s7 = scalar_lea.vmem %s126_s1, 128  ;;  %p216_p3 = scmp.lt.s32.totalorder %s126_s1, %s126_s1 }
  0x2a   :  { %p212_p2 = scmp.ne.s32.totalorder %s126_s1, %s211_s7  ;;  %p217_p4 = scmp.lt.s32.totalorder %s211_s7, %s211_s7 }
  0x2c   :  { %152 = vmatpush3.bf16.msra.mxu0 %v165_v2  ;;  %p218_p5 = por %p217_p4, %p216_p3 }
  0x2e   :  { %p219_p6 = pnand %p218_p5, %p212_p2 }
  0x2f   :  { %154 = vmatmul.mubr.msk.bf16.vlgmr.msra.gmra.mrb[0].mxu0 %vm64_vm1, %v166_v3 }
 0x102   :  { %v102_v4 = vpop.f32.mrb[0].mxu0 }
 0x103   :  { %v144_v5 = vpack.c.bf16 %v102_v4, %v102_v4  ;;  %v155_v6 = vpop.f32.mrb[1].mxu0 }
 0x104   :  { %v105_v7 = vpop.f32.mrb[2].mxu0 }
 0x105   :  { %v145_v8 = vpack.c.bf16 %v105_v7, %v105_v7  ;;  %v156_v9 = vpop.f32.mrb[3].mxu0  ;;  %118 = vst.msk [vmem:[#allocation7] sm:$0xf] %vm117_vm2, %v144_v5 }
 0x107   :  { %119 = vst.msk [vmem:[#allocation7 + $0x4] sm:$0xf] %vm117_vm2, %v145_v8 }
 0x108   :  { %222 = shalt.err (!%p219_p6)
}
 0x109   :  { %s223_s10 = scalar_lea.hbm %s308_s2, 128 }
 0x10a   :  { %p224_p7 = scmp.ne.s32.totalorder %s308_s2, %s223_s10  ;;  %p227_p8 = scmp.lt.u32.totalorder %s223_s10, %s308_s2 }
 0x10c   :  { %p229_p9 = pnand %p227_p8, %p224_p7 }
 0x10e   :  { %232 = shalt.err (!%p229_p9)
}
 0x10f   :  { %131 = dma.vmem_to_hbm [thread:$0]  %s126_s1, 128, %s308_s2, [#allocation4], %s240_s19, %s240_s19, %s241_s20  }
 0x110   :  { %237 = dma.done.wait [#allocation4], 128  }
 0x111   :  { %238 = vsyncadd [#allocation4], 4294967168 }
 0x112   :  { %135 = vsyncpa [#allocation3], 1 }
 0x113   :  { %136 = vsyncpa [#allocation6], 1 }
 0x114   :  { %137 = vsyncpa [#allocation4], 1 }

</bundles_post_ra>
